<compile_context>
chip_gen: v6e
topology: v6e:2x2x1
jax: 0.10.0
libtpu: 0.0.40
codegen_flags: <defaults>
</compile_context>

<pallas_src>
from functools import partial

import jax
import jax.numpy as jnp
from jax.experimental import pallas as pl
from jax.experimental.pallas import tpu as pltpu

LANE = 128      # TPU lane width (last dim)
SUBLANE = 8     # f32 sublane height (second-to-last dim)
TB_MAX = 512    # max batch-tile rows (per perf review: 512-1024 ~ 85% of roofline)


def _round_up(x, m):
    return ((x + m - 1) // m) * m


def _num_tensorcores():
    """2 TensorCores/chip on v7x, otherwise 1 (v5e/v6e). Best-effort probe."""
    try:
        kind = jax.devices()[0].device_kind.lower()
        return 2 if "v7" in kind else 1
    except Exception:  # pragma: no cover - conservative fallback
        return 1


# ----------------------------------------------------------------------------
# Kernel
# ----------------------------------------------------------------------------
def _mlp_kernel(x_ref, w1_ref, b1_ref, w2_ref, b2_ref, w3_ref, b3_ref, o_ref):
    # x_ref: (TB, d_in); weights stored (in, out); biases (1, out). All f32.
    x = x_ref[...]
    h = jnp.dot(x, w1_ref[...], preferred_element_type=jnp.float32) + b1_ref[...]
    h = jnp.maximum(h, 0.0)                                           # ReLU
    h = jnp.dot(h, w2_ref[...], preferred_element_type=jnp.float32) + b2_ref[...]
    h = jnp.maximum(h, 0.0)                                           # ReLU
    out = jnp.dot(h, w3_ref[...], preferred_element_type=jnp.float32) + b3_ref[...]
    o_ref[...] = out.astype(o_ref.dtype)


# ----------------------------------------------------------------------------
# Parameter preparation (run once per parameter update, NOT per forward)
# ----------------------------------------------------------------------------
def _pad2(a, rows, cols):
    """Zero-pad a 2-D array up to (rows, cols)."""
    a = jnp.asarray(a, jnp.float32)
    if a.shape == (rows, cols):
        return a
    return jnp.zeros((rows, cols), jnp.float32).at[: a.shape[0], : a.shape[1]].set(a)


def prepare_params(params):
    """Pad weights/biases to lane-dense shapes once.  Input dim stays unpadded."""
    d_in = params["w1"].shape[0]
    h1 = params["w1"].shape[1]
    h2 = params["w2"].shape[1]
    n_actions = params["w3"].shape[1]

    h1_pad = _round_up(h1, LANE)
    h2_pad = _round_up(h2, LANE)
    n_pad = _round_up(n_actions, LANE)

    return {
        "w1": _pad2(params["w1"], d_in, h1_pad),            # (d_in, h1_pad) - K unpadded
        "b1": _pad2(jnp.reshape(params["b1"], (1, -1)), 1, h1_pad),
        "w2": _pad2(params["w2"], h1_pad, h2_pad),
        "b2": _pad2(jnp.reshape(params["b2"], (1, -1)), 1, h2_pad),
        "w3": _pad2(params["w3"], h2_pad, n_pad),
        "b3": _pad2(jnp.reshape(params["b3"], (1, -1)), 1, n_pad),
        "n_actions": int(n_actions),                        # static metadata
    }


# ----------------------------------------------------------------------------
# Jitted forward (pads activations, runs pallas_call, slices output)
# ----------------------------------------------------------------------------
@partial(jax.jit, static_argnames=("n_actions",))
def _forward_batch_impl(x_batch, w1, b1, w2, b2, w3, b3, *, n_actions):
    B, d_in = x_batch.shape
    h1_pad = w1.shape[1]
    h2_pad = w2.shape[1]
    n_pad = w3.shape[1]

    # Batch tile: fill the MXU at large B, stay cheap at tiny B.  On v7x use
    # >=2 balanced grid steps so both TensorCores get work; on 1-TC chips the
    # grid is serial, so keep it to a single step whenever the batch fits.
    num_tc = _num_tensorcores()
    target_rows = pl.cdiv(B, num_tc)
    tb = min(TB_MAX, _round_up(max(target_rows, 1), SUBLANE))
    b_pad = _round_up(B, tb)
    grid = (b_pad // tb,)

    if b_pad == B:
        xp = x_batch
    else:
        xp = jnp.zeros((b_pad, d_in), jnp.float32).at[:B, :].set(x_batch)

    def full(shape):
        # Constant block index -> tile stays VMEM-resident across grid steps.
        return pl.BlockSpec(shape, lambda i: (0, 0))

    out = pl.pallas_call(
        _mlp_kernel,
        out_shape=jax.ShapeDtypeStruct((b_pad, n_pad), jnp.float32),
        grid=grid,
        in_specs=[
            pl.BlockSpec((tb, d_in), lambda i: (i, 0)),   # activations, tiled over batch
            full((d_in, h1_pad)), full((1, h1_pad)),      # fc1 (K unpadded, full dim)
            full((h1_pad, h2_pad)), full((1, h2_pad)),    # fc2
            full((h2_pad, n_pad)), full((1, n_pad)),      # fc3
        ],
        out_specs=pl.BlockSpec((tb, n_pad), lambda i: (i, 0)),
        compiler_params=pltpu.CompilerParams(
            dimension_semantics=("parallel",),            # batch axis -> v7x 2-TC split
        ),
    )(xp, w1, b1, w2, b2, w3, b3)

    # Slice fused into the same executable (no eager copy per call).
    return out[:B, :n_actions]


def generic_network_forward_batch(x_batch, padded_params):
    """Batched MLP forward: x_batch (B, input_dims) -> (B, n_actions)."""
    x_batch = jnp.asarray(x_batch, jnp.float32)
    pp = padded_params
    return _forward_batch_impl(
        x_batch, pp["w1"], pp["b1"], pp["w2"], pp["b2"], pp["w3"], pp["b3"],
        n_actions=pp["n_actions"])


def generic_network_forward(observation, padded_params):
    """Exact GenericNetwork.forward semantics: flatten obs, return (n_actions,)."""
    x = jnp.asarray(observation, jnp.float32).reshape(1, -1)   # torch.flatten -> (1, D)
    return generic_network_forward_batch(x, padded_params)[0]


# ----------------------------------------------------------------------------
# Init + reference
# ----------------------------------------------------------------------------
def init_params(key, input_dims, fc1_dims, fc2_dims, n_actions):
    """nn.Linear-style init (uniform +-1/sqrt(fan_in)); weights stored (in, out)."""
    def linear(k, fan_in, fan_out):
        kw, kb = jax.random.split(k)
        bound = 1.0 / jnp.sqrt(float(fan_in))
        w = jax.random.uniform(kw, (fan_in, fan_out), jnp.float32, -bound, bound)
        b = jax.random.uniform(kb, (1, fan_out), jnp.float32, -bound, bound)
        return w, b

    k1, k2, k3 = jax.random.split(key, 3)
    w1, b1 = linear(k1, input_dims, fc1_dims)
    w2, b2 = linear(k2, fc1_dims, fc2_dims)
    w3, b3 = linear(k3, fc2_dims, n_actions)
    return {"w1": w1, "b1": b1, "w2": w2, "b2": b2, "w3": w3, "b3": b3}


def _reference_forward_batch(x, params):
    """Plain-JAX reference (unpadded) for correctness checking."""
    h = jnp.maximum(x @ params["w1"] + params["b1"], 0.0)
    h = jnp.maximum(h @ params["w2"] + params["b2"], 0.0)
    return h @ params["w3"] + params["b3"]


if __name__ == "__main__":
    # Shapes consistent with the module: observation flattens to
    # input_dims = 2*4*4 = 32, fc1_dims = 64, fc2_dims = 64, n_actions = 8.
    input_shape = (2, 4, 4)
    input_dims, fc1_dims, fc2_dims, n_actions = 32, 64, 64, 8

    key = jax.random.PRNGKey(0)
    k_obs, k_batch, k_par = jax.random.split(key, 3)
    params = init_params(k_par, input_dims, fc1_dims, fc2_dims, n_actions)
    padded = prepare_params(params)          # pad weights ONCE, reuse every call

    # 1) Single-observation path (exact PyTorch module semantics).
    observation = jax.random.normal(k_obs, input_shape, jnp.float32)
    out_single = jax.block_until_ready(generic_network_forward(observation, padded))
    ref_single = _reference_forward_batch(
        jnp.asarray(observation, jnp.float32).reshape(1, -1), params)[0]
    assert out_single.shape == (n_actions,)
    assert jnp.allclose(out_single, ref_single, atol=1e-5, rtol=1e-5), \
        "single-obs mismatch vs reference"

    # 2) Batched path (perf path): B=256 observations.
    B = 256
    obs_batch = jax.random.normal(k_batch, (B,) + input_shape, jnp.float32)
    x_batch = obs_batch.reshape(B, -1)                     # per-sample flatten
    out_batch = jax.block_until_ready(generic_network_forward_batch(x_batch, padded))
    ref_batch = _reference_forward_batch(x_batch, params)
    assert out_batch.shape == (B, n_actions)
    assert jnp.allclose(out_batch, ref_batch, atol=1e-4, rtol=1e-4), \
        "batched mismatch vs reference"

    print("KERNEL_OK")
</pallas_src>

<mosaic_0001>
module attributes {stable_mosaic.version = 11 : i64} {
  func.func @_mlp_kernel(%arg0: i32, %arg1: memref<8x32xf32, #tpu.memory_space<vmem>>, %arg2: memref<32x128xf32, #tpu.memory_space<vmem>>, %arg3: memref<1x128xf32, #tpu.memory_space<vmem>>, %arg4: memref<128x128xf32, #tpu.memory_space<vmem>>, %arg5: memref<1x128xf32, #tpu.memory_space<vmem>>, %arg6: memref<128x128xf32, #tpu.memory_space<vmem>>, %arg7: memref<1x128xf32, #tpu.memory_space<vmem>>, %arg8: memref<8x128xf32, #tpu.memory_space<vmem>>) attributes {dimension_semantics = [#tpu.dimension_semantics<parallel>], iteration_bounds = array<i64: 1>, scalar_prefetch = 0 : i64, scratch_operands = 0 : i64, tpu.core_type = #tpu.core_type<tc>, window_params = [{transform_indices = @transform_0, window_bounds = array<i64: 8, 32>}, {pipeline_mode = #tpu.pipeline_mode<synchronous>, transform_indices = @transform_1, window_bounds = array<i64: 32, 128>}, {pipeline_mode = #tpu.pipeline_mode<synchronous>, transform_indices = @transform_2, window_bounds = array<i64: 1, 128>}, {pipeline_mode = #tpu.pipeline_mode<synchronous>, transform_indices = @transform_3, window_bounds = array<i64: 128, 128>}, {pipeline_mode = #tpu.pipeline_mode<synchronous>, transform_indices = @transform_4, window_bounds = array<i64: 1, 128>}, {pipeline_mode = #tpu.pipeline_mode<synchronous>, transform_indices = @transform_5, window_bounds = array<i64: 128, 128>}, {pipeline_mode = #tpu.pipeline_mode<synchronous>, transform_indices = @transform_6, window_bounds = array<i64: 1, 128>}, {transform_indices = @transform_7, window_bounds = array<i64: 8, 128>}]} {
    %c0 = arith.constant 0 : index
    %c0_0 = arith.constant 0 : index
    %0 = vector.load %arg1[%c0, %c0_0] : memref<8x32xf32, #tpu.memory_space<vmem>>, vector<8x32xf32>
    %c0_1 = arith.constant 0 : index
    %c0_2 = arith.constant 0 : index
    %1 = vector.load %arg2[%c0_1, %c0_2] : memref<32x128xf32, #tpu.memory_space<vmem>>, vector<32x128xf32>
    %cst = arith.constant dense<0.000000e+00> : vector<8x128xf32>
    %2 = tpu.matmul %0, %1, %cst {dimension_numbers = #tpu.dot_dimension_numbers<[1], [0], [0], [1], [0, 0, 1, 1], [], []>} : vector<8x32xf32>, vector<32x128xf32>, vector<8x128xf32> -> vector<8x128xf32>
    %c0_3 = arith.constant 0 : index
    %c0_4 = arith.constant 0 : index
    %3 = vector.load %arg3[%c0_3, %c0_4] : memref<1x128xf32, #tpu.memory_space<vmem>>, vector<1x128xf32>
    %4 = vector.broadcast %3 : vector<1x128xf32> to vector<8x128xf32>
    %5 = arith.addf %2, %4 : vector<8x128xf32>
    %cst_5 = arith.constant 0.000000e+00 : f32
    %6 = vector.broadcast %cst_5 : f32 to vector<8x128xf32>
    %7 = arith.maximumf %5, %6 : vector<8x128xf32>
    %c0_6 = arith.constant 0 : index
    %c0_7 = arith.constant 0 : index
    %8 = vector.load %arg4[%c0_6, %c0_7] : memref<128x128xf32, #tpu.memory_space<vmem>>, vector<128x128xf32>
    %cst_8 = arith.constant dense<0.000000e+00> : vector<8x128xf32>
    %9 = tpu.matmul %7, %8, %cst_8 {dimension_numbers = #tpu.dot_dimension_numbers<[1], [0], [0], [1], [0, 0, 1, 1], [], []>} : vector<8x128xf32>, vector<128x128xf32>, vector<8x128xf32> -> vector<8x128xf32>
    %c0_9 = arith.constant 0 : index
    %c0_10 = arith.constant 0 : index
    %10 = vector.load %arg5[%c0_9, %c0_10] : memref<1x128xf32, #tpu.memory_space<vmem>>, vector<1x128xf32>
    %11 = vector.broadcast %10 : vector<1x128xf32> to vector<8x128xf32>
    %12 = arith.addf %9, %11 : vector<8x128xf32>
    %cst_11 = arith.constant 0.000000e+00 : f32
    %13 = vector.broadcast %cst_11 : f32 to vector<8x128xf32>
    %14 = arith.maximumf %12, %13 : vector<8x128xf32>
    %c0_12 = arith.constant 0 : index
    %c0_13 = arith.constant 0 : index
    %15 = vector.load %arg6[%c0_12, %c0_13] : memref<128x128xf32, #tpu.memory_space<vmem>>, vector<128x128xf32>
    %cst_14 = arith.constant dense<0.000000e+00> : vector<8x128xf32>
    %16 = tpu.matmul %14, %15, %cst_14 {dimension_numbers = #tpu.dot_dimension_numbers<[1], [0], [0], [1], [0, 0, 1, 1], [], []>} : vector<8x128xf32>, vector<128x128xf32>, vector<8x128xf32> -> vector<8x128xf32>
    %c0_15 = arith.constant 0 : index
    %c0_16 = arith.constant 0 : index
    %17 = vector.load %arg7[%c0_15, %c0_16] : memref<1x128xf32, #tpu.memory_space<vmem>>, vector<1x128xf32>
    %18 = vector.broadcast %17 : vector<1x128xf32> to vector<8x128xf32>
    %19 = arith.addf %16, %18 : vector<8x128xf32>
    %c0_17 = arith.constant 0 : index
    %c0_18 = arith.constant 0 : index
    %20 = vector.load %arg8[%c0_17, %c0_18] : memref<8x128xf32, #tpu.memory_space<vmem>>, vector<8x128xf32>
    tpu.vector_store %arg8[%c0_17, %c0_18], %19 {strides = array<i32>} : memref<8x128xf32, #tpu.memory_space<vmem>>, vector<8x128xf32>,
    return
  }
  func.func @transform_0(%arg0: i32) -> (i32, i32) {
    %c0_i32 = arith.constant 0 : i32
    %c0_i32_0 = arith.constant 0 : i32
    return %arg0, %c0_i32 : i32, i32
  }
  func.func @transform_1(%arg0: i32) -> (i32, i32) {
    %c0_i32 = arith.constant 0 : i32
    %c0_i32_0 = arith.constant 0 : i32
    %c0_i32_1 = arith.constant 0 : i32
    return %c0_i32, %c0_i32_0 : i32, i32
  }
  func.func @transform_2(%arg0: i32) -> (i32, i32) {
    %c0_i32 = arith.constant 0 : i32
    %c0_i32_0 = arith.constant 0 : i32
    %c0_i32_1 = arith.constant 0 : i32
    return %c0_i32, %c0_i32_0 : i32, i32
  }
  func.func @transform_3(%arg0: i32) -> (i32, i32) {
    %c0_i32 = arith.constant 0 : i32
    %c0_i32_0 = arith.constant 0 : i32
    %c0_i32_1 = arith.constant 0 : i32
    return %c0_i32, %c0_i32_0 : i32, i32
  }
  func.func @transform_4(%arg0: i32) -> (i32, i32) {
    %c0_i32 = arith.constant 0 : i32
    %c0_i32_0 = arith.constant 0 : i32
    %c0_i32_1 = arith.constant 0 : i32
    return %c0_i32, %c0_i32_0 : i32, i32
  }
  func.func @transform_5(%arg0: i32) -> (i32, i32) {
    %c0_i32 = arith.constant 0 : i32
    %c0_i32_0 = arith.constant 0 : i32
    %c0_i32_1 = arith.constant 0 : i32
    return %c0_i32, %c0_i32_0 : i32, i32
  }
  func.func @transform_6(%arg0: i32) -> (i32, i32) {
    %c0_i32 = arith.constant 0 : i32
    %c0_i32_0 = arith.constant 0 : i32
    %c0_i32_1 = arith.constant 0 : i32
    return %c0_i32, %c0_i32_0 : i32, i32
  }
  func.func @transform_7(%arg0: i32) -> (i32, i32) {
    %c0_i32 = arith.constant 0 : i32
    %c0_i32_0 = arith.constant 0 : i32
    return %arg0, %c0_i32 : i32, i32
  }
}

</mosaic_0001>

<bundles_post_ra>
// kernel: _forward_batch_impl.1
= control target key start
LH: loop header
LB: loop body
LE: loop exit
PB: predicated region body
PF: predicated region fallthrough
CT: control target
= control target key end

     0   :  { %12 = vsyncpa [#allocation3], 0  ;;  %s656_s0 = inlined_call_operand.vmem [shape: f32[8,32], index: 0, kind: input, shape index: {}]   ;;  %s657_s1 = inlined_call_operand.hbm [shape: f32[32,128], index: 1, kind: input, shape index: {}]   ;;  %s658_s2 = inlined_call_operand.vmem [shape: f32[1,128], index: 2, kind: input, shape index: {}]   ;;  %s659_s3 = inlined_call_operand.hbm [shape: f32[128,128], index: 3, kind: input, shape index: {}]   ;;  %s660_s4 = inlined_call_operand.vmem [shape: f32[1,128], index: 4, kind: input, shape index: {}]   ;;  %s661_s5 = inlined_call_operand.hbm [shape: f32[128,128], index: 5, kind: input, shape index: {}]   ;;  %s662_s6 = inlined_call_operand.vmem [shape: f32[1,128], index: 6, kind: input, shape index: {}]   ;;  %s663_s7 = inlined_call_operand.vmem [shape: f32[8,128], index: 7, kind: output, shape index: {}]  }
   0x1   :  { %13 = vsyncpa [#allocation5], 0  ;;  %s543_s24 = smov [#allocation4]   ;;  %s544_s26 = smov [#allocation2]  }
   0x2   :  { %s35_s25 = sshll.u32 %s543_s24, 4  ;;  %s21_s27 = sshll.u32 %s544_s26, 4  ;;  %s36_s25 = int_to_ptr.vmem [resolvable:$true] %s35_s25  ;;  %s22_s27 = int_to_ptr.vmem [resolvable:$true] %s21_s27 }
   0x3   :  { %s487_s28 = scalar_lea.vmem %s36_s25, 2048  ;;  %p492_p1 = scmp.lt.s32.totalorder %s36_s25, %s36_s25 }
   0x4   :  { %p488_p0 = scmp.ne.s32.totalorder %s36_s25, %s487_s28  ;;  %p493_p2 = scmp.lt.s32.totalorder %s487_s28, %s487_s28 }
   0x6   :  { %p494_p3 = por %p493_p2, %p492_p1 }
   0x8   :  { %p495_p4 = pnand %p494_p3, %p488_p0 }
   0xa   :  { %498 = shalt.err (!%p495_p4)
}
   0xb   :  { %s545_s29 = smov 128   ;;  %s546_s30 = smov 8  }
   0xc   :  { %41 = dma.hbm_to_vmem [thread:$0]  %s659_s3, 2048, %s36_s25, [#allocation5], %s545_s29, %s545_s29, %s546_s30  }
   0xd   :  { %s507_s10 = scalar_lea.vmem %s22_s27, 512  ;;  %p512_p6 = scmp.lt.s32.totalorder %s22_s27, %s22_s27 }
   0xe   :  { %p508_p5 = scmp.ne.s32.totalorder %s22_s27, %s507_s10  ;;  %p513_p7 = scmp.lt.s32.totalorder %s507_s10, %s507_s10 }
  0x10   :  { %p514_p8 = por %p513_p7, %p512_p6 }
  0x12   :  { %p515_p9 = pnand %p514_p8, %p508_p5 }
  0x14   :  { %518 = shalt.err (!%p515_p9)
}
  0x15   :  { %27 = dma.hbm_to_vmem [thread:$0]  %s657_s1, 512, %s22_s27, [#allocation3], %s545_s29, %s545_s29, %s546_s30  }
  0x16   :  { %s547_s13 = smov [#allocation6]  }
  0x17   :  { %s49_s14 = sshll.u32 %s547_s13, 4  ;;  %s50_s14 = int_to_ptr.vmem [resolvable:$true] %s49_s14 }
  0x18   :  { %s527_s15 = scalar_lea.vmem %s50_s14, 2048  ;;  %p532_p11 = scmp.lt.s32.totalorder %s50_s14, %s50_s14 }
  0x19   :  { %p528_p10 = scmp.ne.s32.totalorder %s50_s14, %s527_s15  ;;  %p533_p12 = scmp.lt.s32.totalorder %s527_s15, %s527_s15 }
  0x1b   :  { %p534_p13 = por %p533_p12, %p532_p11 }
  0x1d   :  { %p535_p0 = pnand %p534_p13, %p528_p10 }
  0x1f   :  { %538 = shalt.err (!%p535_p0)
}
  0x20   :  { %55 = dma.hbm_to_vmem [thread:$0]  %s661_s5, 2048, %s50_s14, [#allocation5], %s545_s29, %s545_s29, %s546_s30  }
  0x21   :  { %539 = dma.done.wait [#allocation3], 512  }
  0x22   :  { %540 = vsyncadd [#allocation3], 4294966784 }
  0x23   :  { %541 = dma.done.wait [#allocation5], 4096  }
  0x24   :  { %542 = vsyncadd [#allocation5], 4294963200  ;;  %v548_v0 = vmov 0.0   ;;  %vm549_vm0 = vmmov 0   ;;  %v71_v1 = vld [vmem:[#allocation2 + $0x18] sm:$0xff]  ;;  %v70_v2 = vld [vmem:[#allocation2 + $0x10] sm:$0xff] }
  0x25   :  { %391 = vmatprep.subr.mxu0 %v548_v0  ;;  %399 = vmatprep.mubr.msk.f32.mxu0 %vm549_vm0, %v548_v0  ;;  %v169_v3 = vld [vmem:[#allocation4 + $0x78] sm:$0xff]  ;;  %v69_v4 = vld [vmem:[#allocation2 + $0x8] sm:$0xff]  ;;  %v168_v5 = vld [vmem:[#allocation4 + $0x70] sm:$0xff]  ;;  %vm79_vm1 = vcmask 261120  }
  0x26   :  { %402 = vmatprep.subr.mxu1 %v548_v0  ;;  %434 = vmatprep.mubr.msk.f32.mxu1 %vm549_vm0, %v548_v0  ;;  %v167_v6 = vld [vmem:[#allocation4 + $0x68] sm:$0xff]  ;;  %v68_v7 = vld [vmem:[#allocation2] sm:$0xff]  ;;  %v165_v10 = vld [vmem:[#allocation4 + $0x58] sm:$0xff] }
  0x27   :  { %392 = vmatpush3.msra.mxu0 %v71_v1  ;;  %403 = vmatpush3.msra.mxu1 %v169_v3  ;;  %v67_v8 = vld [vmem:[%s656_s0] sm:$0xff]  ;;  %v164_v11 = vld [vmem:[#allocation4 + $0x50] sm:$0xff]  ;;  %v163_v12 = vld [vmem:[#allocation4 + $0x48] sm:$0xff] }
  0x28   :  { %393 = vmatprep.subr.mxu0 %v548_v0  ;;  %404 = vmatprep.subr.mxu1 %v548_v0  ;;  %v166_v9 = vld [vmem:[#allocation4 + $0x60] sm:$0xff]  ;;  %v161_v14 = vld [vmem:[#allocation4 + $0x38] sm:$0xff]  ;;  %v160_v15 = vld [vmem:[#allocation4 + $0x30] sm:$0xff] }
  0x29   :  { %394 = vmatpush3.msra.mxu0 %v70_v2  ;;  %405 = vmatpush3.msra.mxu1 %v168_v5  ;;  %v162_v13 = vld [vmem:[#allocation4 + $0x40] sm:$0xff]  ;;  %v159_v16 = vld [vmem:[#allocation4 + $0x28] sm:$0xff]  ;;  %v157_v18 = vld [vmem:[#allocation4 + $0x18] sm:$0xff] }
  0x2a   :  { %395 = vmatprep.subr.mxu0 %v548_v0  ;;  %406 = vmatprep.subr.mxu1 %v548_v0  ;;  %v158_v17 = vld [vmem:[#allocation4 + $0x20] sm:$0xff]  ;;  %v156_v19 = vld [vmem:[#allocation4 + $0x10] sm:$0xff]  ;;  %v155_v20 = vld [vmem:[#allocation4 + $0x8] sm:$0xff] }
  0x2b   :  { %396 = vmatpush3.msra.mxu0 %v69_v4  ;;  %407 = vmatpush3.msra.mxu1 %v167_v6  ;;  %v154_v21 = vld [vmem:[#allocation4] sm:$0xff]  ;;  %v263_v22 = vld [vmem:[#allocation6 + $0x78] sm:$0xff]  ;;  %v262_v23 = vld [vmem:[#allocation6 + $0x70] sm:$0xff] }
  0x2c   :  { %397 = vmatprep.subr.mxu0 %v548_v0  ;;  %408 = vmatprep.subr.mxu1 %v548_v0  ;;  %v261_v24 = vld [vmem:[#allocation6 + $0x68] sm:$0xff]  ;;  %v260_v25 = vld [vmem:[#allocation6 + $0x60] sm:$0xff]  ;;  %v259_v26 = vld [vmem:[#allocation6 + $0x58] sm:$0xff] }
  0x2d   :  { %398 = vmatpush3.msra.mxu0 %v68_v7  ;;  %409 = vmatpush3.msra.mxu1 %v166_v9  ;;  %v258_v27 = vld [vmem:[#allocation6 + $0x50] sm:$0xff]  ;;  %v257_v28 = vld [vmem:[#allocation6 + $0x48] sm:$0xff]  ;;  %v256_v29 = vld [vmem:[#allocation6 + $0x40] sm:$0xff] }
  0x2e   :  { %400 = vmatmul.mubr.msk.f32.vlgmr.msra.gmra.mxu0 %vm79_vm1, %v67_v8  ;;  %410 = vmatprep.subr.mxu1 %v548_v0  ;;  %v255_v30 = vld [vmem:[#allocation6 + $0x38] sm:$0xff]  ;;  %v254_v31 = vld [vmem:[#allocation6 + $0x30] sm:$0xff]  ;;  %v253_v32 = vld [vmem:[#allocation6 + $0x28] sm:$0xff] }
  0x2f   :  { %437 = vmatprep.subr.mxu0 %v548_v0  ;;  %411 = vmatpush3.msra.mxu1 %v165_v10  ;;  %v252_v33 = vld [vmem:[#allocation6 + $0x20] sm:$0xff]  ;;  %v251_v34 = vld [vmem:[#allocation6 + $0x18] sm:$0xff]  ;;  %v250_v40 = vld [vmem:[#allocation6 + $0x10] sm:$0xff] }
  0x30   :  { %469 = vmatprep.mubr.msk.f32.mxu0 %vm549_vm0, %v548_v0  ;;  %412 = vmatprep.subr.mxu1 %v548_v0  ;;  %v348_v35 = vld [vmem:[%s658_s2] ss:$0 sm:$0xff]  ;;  %v249_v41 = vld [vmem:[#allocation6 + $0x8] sm:$0xff] }
  0x31   :  { %413 = vmatpush3.msra.mxu1 %v164_v11  ;;  %438 = vmatpush3.msra.mxu0 %v263_v22  ;;  %v248_v42 = vld [vmem:[#allocation6] sm:$0xff] }
  0x32   :  { %414 = vmatprep.subr.mxu1 %v548_v0  ;;  %439 = vmatprep.subr.mxu0 %v548_v0  ;;  %v350_v43 = vld [vmem:[%s660_s4] ss:$0 sm:$0xff] }
  0x33   :  { %415 = vmatpush3.msra.mxu1 %v163_v12  ;;  %440 = vmatpush3.msra.mxu0 %v262_v23  ;;  %v351_v48 = vld [vmem:[%s662_s6] ss:$0 sm:$0xff] }
  0x34   :  { %416 = vmatprep.subr.mxu1 %v548_v0  ;;  %441 = vmatprep.subr.mxu0 %v548_v0 }
  0x35   :  { %417 = vmatpush3.msra.mxu1 %v162_v13  ;;  %442 = vmatpush3.msra.mxu0 %v261_v24 }
  0x36   :  { %418 = vmatprep.subr.mxu1 %v548_v0  ;;  %443 = vmatprep.subr.mxu0 %v548_v0 }
  0x37   :  { %419 = vmatpush3.msra.mxu1 %v161_v14  ;;  %444 = vmatpush3.msra.mxu0 %v260_v25 }
  0x38   :  { %420 = vmatprep.subr.mxu1 %v548_v0  ;;  %445 = vmatprep.subr.mxu0 %v548_v0 }
  0x39   :  { %421 = vmatpush3.msra.mxu1 %v160_v15  ;;  %446 = vmatpush3.msra.mxu0 %v259_v26 }
  0x3a   :  { %422 = vmatprep.subr.mxu1 %v548_v0  ;;  %447 = vmatprep.subr.mxu0 %v548_v0 }
  0x3b   :  { %423 = vmatpush3.msra.mxu1 %v159_v16  ;;  %448 = vmatpush3.msra.mxu0 %v258_v27 }
  0x3c   :  { %424 = vmatprep.subr.mxu1 %v548_v0  ;;  %449 = vmatprep.subr.mxu0 %v548_v0 }
  0x3d   :  { %425 = vmatpush3.msra.mxu1 %v158_v17  ;;  %450 = vmatpush3.msra.mxu0 %v257_v28 }
  0x3e   :  { %426 = vmatprep.subr.mxu1 %v548_v0  ;;  %451 = vmatprep.subr.mxu0 %v548_v0 }
  0x3f   :  { %427 = vmatpush3.msra.mxu1 %v157_v18  ;;  %452 = vmatpush3.msra.mxu0 %v256_v29 }
  0x40   :  { %428 = vmatprep.subr.mxu1 %v548_v0  ;;  %453 = vmatprep.subr.mxu0 %v548_v0 }
  0x41   :  { %429 = vmatpush3.msra.mxu1 %v156_v19  ;;  %454 = vmatpush3.msra.mxu0 %v255_v30 }
  0x42   :  { %430 = vmatprep.subr.mxu1 %v548_v0  ;;  %455 = vmatprep.subr.mxu0 %v548_v0 }
  0x43   :  { %431 = vmatpush3.msra.mxu1 %v155_v20  ;;  %456 = vmatpush3.msra.mxu0 %v254_v31 }
  0x44   :  { %432 = vmatprep.subr.mxu1 %v548_v0  ;;  %457 = vmatprep.subr.mxu0 %v548_v0 }
  0x45   :  { %433 = vmatpush3.msra.mxu1 %v154_v21  ;;  %458 = vmatpush3.msra.mxu0 %v253_v32 }
  0x46   :  { %459 = vmatprep.subr.mxu0 %v548_v0 }
  0x47   :  { %460 = vmatpush3.msra.mxu0 %v252_v33 }
  0x48   :  { %461 = vmatprep.subr.mxu0 %v548_v0 }
  0x49   :  { %462 = vmatpush3.msra.mxu0 %v251_v34 }
  0x4a   :  { %463 = vmatprep.subr.mxu0 %v548_v0 }
  0x4b   :  { %464 = vmatpush3.msra.mxu0 %v250_v40 }
  0x4c   :  { %465 = vmatprep.subr.mxu0 %v548_v0 }
  0x4d   :  { %466 = vmatpush3.msra.mxu0 %v249_v41 }
  0x4e   :  { %467 = vmatprep.subr.mxu0 %v548_v0 }
  0x4f   :  { %468 = vmatpush3.msra.mxu0 %v248_v42 }
  0xee   :  { %v149_v36 = vpop.f32.mrf.mxu0 }
  0xef   :  { %v150_v37 = vadd.f32 %v348_v35, %v149_v36 }
  0xf0   :  { %v401_v38 = vpop.f32.mrf.mxu0 }
  0xf1   :  { %v153_v39 = vmax.f32 %v150_v37, 0.0 }
  0xf3   :  { %435 = vmatmul.mubr.f32.vlgmr.msra.gmra.mxu1 %v153_v39 }
 0x1b3   :  { %v243_v44 = vpop.f32.mrf.mxu1 }
 0x1b4   :  { %v244_v45 = vadd.f32 %v350_v43, %v243_v44 }
 0x1b5   :  { %v436_v46 = vpop.f32.mrf.mxu1 }
 0x1b6   :  { %v247_v47 = vmax.f32 %v244_v45, 0.0 }
 0x1b8   :  { %470 = vmatmul.mubr.f32.vlgmr.msra.gmra.mxu0 %v247_v47 }
 0x278   :  { %v337_v49 = vpop.f32.mrf.mxu0 }
 0x279   :  { %v338_v50 = vadd.f32 %v351_v48, %v337_v49 }
 0x27a   :  { %v471_v51 = vpop.f32.mrf.mxu0 }
 0x27b   :  { %341 = vst [vmem:[%s663_s7] sm:$0xff] %v338_v50 }
 0x27c   :  { %346 = vsyncpa [#allocation3], 1 }
 0x27d   :  { %347 = vsyncpa [#allocation5], 1 }

</bundles_post_ra>
